<compile_context>
chip_gen: v5e
topology: v5e:2x2
jax: 0.10.0
libtpu: 0.0.40
codegen_flags: <defaults>
</compile_context>

<pallas_src>
import jax
import jax.numpy as jnp
from jax.experimental import pallas as pl
from jax.experimental.pallas import tpu as pltpu


def _round_up(x, m):
    return ((x + m - 1) // m) * m


def _node_embed_kernel(x_ref, w1_ref, b1_ref, w2_ref, b2_ref, out_ref):
    """Fused 2-layer MLP on one row tile: relu(relu(x @ W1 + b1) @ W2 + b2)."""
    x = x_ref[...]                                            # [TN, F]
    # Layer 1: MXU matmul with f32 accumulation; bias add + ReLU on VPU (f32).
    h = jnp.dot(x, w1_ref[...], preferred_element_type=jnp.float32)
    h = jnp.maximum(h + b1_ref[...], 0.0)                     # [TN, E] f32
    # Layer 2: cast hidden to the weight dtype (no-op for f32) for the MXU.
    h = h.astype(w2_ref.dtype)
    y = jnp.dot(h, w2_ref[...], preferred_element_type=jnp.float32)
    y = jnp.maximum(y + b2_ref[...], 0.0)
    out_ref[...] = y.astype(out_ref.dtype)


def prepare_params(params, io_dtype=jnp.float32):
    """One-time (hoisted) cast/reshape of the weights for the kernel.

    params: dict with w1 [F, E], b1 [E], w2 [E, E], b2 [E]
            (w1/w2 already transposed vs. torch's Linear.weight).
    Biases stay f32 (bias add + ReLU run in f32 on the VPU on all chips).
    """
    return {
        "w1": params["w1"].astype(io_dtype),
        "b1": params["b1"].astype(jnp.float32).reshape(1, -1),
        "w2": params["w2"].astype(io_dtype),
        "b2": params["b2"].astype(jnp.float32).reshape(1, -1),
    }


def node_embed_net(node_features, prepared, *, tile_rows=1024,
                   out_dtype=jnp.float32):
    """Forward pass of NodeEmbedNet (num_layers=2) as one fused Pallas kernel.

    node_features: [N, node_features_size]
    prepared: output of prepare_params() (weights already in the I/O dtype).
    """
    n, f = node_features.shape
    e = prepared["w1"].shape[1]
    io_dtype = prepared["w1"].dtype

    x = node_features.astype(io_dtype)   # no-op when dtypes already match

    # Row tile: clamp for tiny N; split so a single big tile becomes >= 2 grid
    # steps (lets v7x shard the "parallel" axis across its two TensorCores).
    tn = min(tile_rows, _round_up(max(n, 1), 8))
    if pl.cdiv(n, tn) < 2 and tn >= 512:
        tn = _round_up(pl.cdiv(tn, 2), 8)
    grid = (pl.cdiv(n, tn),)

    io_bytes = jnp.dtype(io_dtype).itemsize
    out_bytes = jnp.dtype(out_dtype).itemsize
    cost = pl.CostEstimate(
        flops=2 * n * (f * e + e * e),
        transcendentals=0,
        bytes_accessed=(n * f + f * e + e * e) * io_bytes
                       + 2 * e * 4 + n * e * out_bytes,
    )

    out = pl.pallas_call(
        _node_embed_kernel,
        out_shape=jax.ShapeDtypeStruct((n, e), out_dtype),
        grid=grid,
        in_specs=[
            pl.BlockSpec((tn, f), lambda i: (i, 0)),   # x: row-tiled, pipelined
            pl.BlockSpec((f, e), lambda i: (0, 0)),    # w1: VMEM-resident
            pl.BlockSpec((1, e), lambda i: (0, 0)),    # b1: VMEM-resident
            pl.BlockSpec((e, e), lambda i: (0, 0)),    # w2: VMEM-resident
            pl.BlockSpec((1, e), lambda i: (0, 0)),    # b2: VMEM-resident
        ],
        out_specs=pl.BlockSpec((tn, e), lambda i: (i, 0)),
        compiler_params=pltpu.CompilerParams(
            dimension_semantics=("parallel",),          # megacore on v7x
            vmem_limit_bytes=32 * 1024 * 1024,          # explicit, lots of headroom
        ),
        cost_estimate=cost,
    )(x, prepared["w1"], prepared["b1"], prepared["w2"], prepared["b2"])

    return out


def init_params(key, node_features_size, embed_size):
    """Deterministic init mimicking torch.nn.Linear's default (uniform +-1/sqrt(fan_in))."""
    k1, k2, k3, k4 = jax.random.split(key, 4)
    bound1 = 1.0 / jnp.sqrt(node_features_size)
    bound2 = 1.0 / jnp.sqrt(embed_size)
    # Stored as [in, out] == torch Linear.weight.T
    w1 = jax.random.uniform(k1, (node_features_size, embed_size),
                            minval=-bound1, maxval=bound1, dtype=jnp.float32)
    b1 = jax.random.uniform(k2, (embed_size,),
                            minval=-bound1, maxval=bound1, dtype=jnp.float32)
    w2 = jax.random.uniform(k3, (embed_size, embed_size),
                            minval=-bound2, maxval=bound2, dtype=jnp.float32)
    b2 = jax.random.uniform(k4, (embed_size,),
                            minval=-bound2, maxval=bound2, dtype=jnp.float32)
    return {"w1": w1, "b1": b1, "w2": w2, "b2": b2}


def reference_forward(node_features, params, io_dtype=jnp.float32):
    """Plain-JAX reference of the torch forward (tensor path), mirroring kernel dtypes."""
    x = node_features.astype(io_dtype)
    w1 = params["w1"].astype(io_dtype)
    w2 = params["w2"].astype(io_dtype)
    h = jnp.maximum(
        jnp.dot(x, w1, preferred_element_type=jnp.float32) + params["b1"], 0.0)
    h = h.astype(io_dtype)
    y = jnp.maximum(
        jnp.dot(h, w2, preferred_element_type=jnp.float32) + params["b2"], 0.0)
    return y


if __name__ == "__main__":
    # Small shapes consistent with the module: N nodes, feature size, embed size.
    num_nodes = 8
    node_features_size = 16
    embed_size = 32

    key = jax.random.PRNGKey(0)
    k_x, k_p, k_x2, k_x3 = jax.random.split(key, 4)
    x = jax.random.normal(k_x, (num_nodes, node_features_size), dtype=jnp.float32)
    params = init_params(k_p, node_features_size, embed_size)

    # Hoisted, one-time parameter preparation (reused across all calls below).
    pp_f32 = prepare_params(params, io_dtype=jnp.float32)
    pp_bf16 = prepare_params(params, io_dtype=jnp.bfloat16)

    # 1) exact f32 path at the module's toy shape (single small tile, tn=8).
    out = jax.block_until_ready(node_embed_net(x, pp_f32))
    ref = reference_forward(x, params, io_dtype=jnp.float32)
    assert out.shape == (num_nodes, embed_size)
    assert jnp.allclose(out, ref, atol=1e-5, rtol=1e-5), "f32 mismatch vs reference"

    # 2) multi-step grid, bf16 I/O + bf16 output fast path (v6e/v7x): 1024 nodes
    #    -> tile is split to 512 rows so the parallel axis has 2 steps.
    n_big = 1024
    x_big = jax.random.normal(k_x2, (n_big, node_features_size), dtype=jnp.float32)
    out_big = jax.block_until_ready(
        node_embed_net(x_big, pp_bf16, out_dtype=jnp.bfloat16))
    ref_big = reference_forward(x_big, params, io_dtype=jnp.bfloat16)
    assert out_big.shape == (n_big, embed_size)
    assert jnp.allclose(out_big.astype(jnp.float32), ref_big,
                        atol=2e-2, rtol=2e-2), "bf16 mismatch vs reference"

    # 3) non-divisible N (partial last block, masked load/store path), f32 exact.
    n_odd = 1000
    x_odd = jax.random.normal(k_x3, (n_odd, node_features_size), dtype=jnp.float32)
    out_odd = jax.block_until_ready(node_embed_net(x_odd, pp_f32))
    ref_odd = reference_forward(x_odd, params, io_dtype=jnp.float32)
    assert out_odd.shape == (n_odd, embed_size)
    assert jnp.allclose(out_odd, ref_odd, atol=1e-5, rtol=1e-5), \
        "f32 partial-block mismatch vs reference"

    # Note: torch's list-input path (stack -> forward -> unbind) is the same
    # tensor math on a stacked batch; this kernel covers that hot path too.
    print("KERNEL_OK")
</pallas_src>

<mosaic_0001>
module attributes {stable_mosaic.version = 11 : i64} {
  func.func @_node_embed_kernel(%arg0: i32, %arg1: memref<8x16xf32, #tpu.memory_space<vmem>>, %arg2: memref<16x32xf32, #tpu.memory_space<vmem>>, %arg3: memref<1x32xf32, #tpu.memory_space<vmem>>, %arg4: memref<32x32xf32, #tpu.memory_space<vmem>>, %arg5: memref<1x32xf32, #tpu.memory_space<vmem>>, %arg6: memref<8x32xf32, #tpu.memory_space<vmem>>) attributes {dimension_semantics = [#tpu.dimension_semantics<parallel>], iteration_bounds = array<i64: 1>, scalar_prefetch = 0 : i64, scratch_operands = 0 : i64, tpu.core_type = #tpu.core_type<tc>, window_params = [{transform_indices = @transform_0, window_bounds = array<i64: 8, 16>}, {pipeline_mode = #tpu.pipeline_mode<synchronous>, transform_indices = @transform_1, window_bounds = array<i64: 16, 32>}, {pipeline_mode = #tpu.pipeline_mode<synchronous>, transform_indices = @transform_2, window_bounds = array<i64: 1, 32>}, {pipeline_mode = #tpu.pipeline_mode<synchronous>, transform_indices = @transform_3, window_bounds = array<i64: 32, 32>}, {pipeline_mode = #tpu.pipeline_mode<synchronous>, transform_indices = @transform_4, window_bounds = array<i64: 1, 32>}, {transform_indices = @transform_5, window_bounds = array<i64: 8, 32>}]} {
    %c0 = arith.constant 0 : index
    %c0_0 = arith.constant 0 : index
    %0 = vector.load %arg1[%c0, %c0_0] : memref<8x16xf32, #tpu.memory_space<vmem>>, vector<8x16xf32>
    %c0_1 = arith.constant 0 : index
    %c0_2 = arith.constant 0 : index
    %1 = vector.load %arg2[%c0_1, %c0_2] : memref<16x32xf32, #tpu.memory_space<vmem>>, vector<16x32xf32>
    %cst = arith.constant dense<0.000000e+00> : vector<8x32xf32>
    %2 = tpu.matmul %0, %1, %cst {dimension_numbers = #tpu.dot_dimension_numbers<[1], [0], [0], [1], [0, 0, 1, 1], [], []>} : vector<8x16xf32>, vector<16x32xf32>, vector<8x32xf32> -> vector<8x32xf32>
    %c0_3 = arith.constant 0 : index
    %c0_4 = arith.constant 0 : index
    %3 = vector.load %arg3[%c0_3, %c0_4] : memref<1x32xf32, #tpu.memory_space<vmem>>, vector<1x32xf32>
    %4 = vector.broadcast %3 : vector<1x32xf32> to vector<8x32xf32>
    %5 = arith.addf %2, %4 : vector<8x32xf32>
    %cst_5 = arith.constant 0.000000e+00 : f32
    %6 = vector.broadcast %cst_5 : f32 to vector<8x32xf32>
    %7 = arith.maximumf %5, %6 : vector<8x32xf32>
    %c0_6 = arith.constant 0 : index
    %c0_7 = arith.constant 0 : index
    %8 = vector.load %arg4[%c0_6, %c0_7] : memref<32x32xf32, #tpu.memory_space<vmem>>, vector<32x32xf32>
    %cst_8 = arith.constant dense<0.000000e+00> : vector<8x32xf32>
    %9 = tpu.matmul %7, %8, %cst_8 {dimension_numbers = #tpu.dot_dimension_numbers<[1], [0], [0], [1], [0, 0, 1, 1], [], []>} : vector<8x32xf32>, vector<32x32xf32>, vector<8x32xf32> -> vector<8x32xf32>
    %c0_9 = arith.constant 0 : index
    %c0_10 = arith.constant 0 : index
    %10 = vector.load %arg5[%c0_9, %c0_10] : memref<1x32xf32, #tpu.memory_space<vmem>>, vector<1x32xf32>
    %11 = vector.broadcast %10 : vector<1x32xf32> to vector<8x32xf32>
    %12 = arith.addf %9, %11 : vector<8x32xf32>
    %cst_11 = arith.constant 0.000000e+00 : f32
    %13 = vector.broadcast %cst_11 : f32 to vector<8x32xf32>
    %14 = arith.maximumf %12, %13 : vector<8x32xf32>
    %c0_12 = arith.constant 0 : index
    %c0_13 = arith.constant 0 : index
    %15 = vector.load %arg6[%c0_12, %c0_13] : memref<8x32xf32, #tpu.memory_space<vmem>>, vector<8x32xf32>
    tpu.vector_store %arg6[%c0_12, %c0_13], %14 {strides = array<i32>} : memref<8x32xf32, #tpu.memory_space<vmem>>, vector<8x32xf32>,
    return
  }
  func.func @transform_0(%arg0: i32) -> (i32, i32) {
    %c0_i32 = arith.constant 0 : i32
    %c0_i32_0 = arith.constant 0 : i32
    return %arg0, %c0_i32 : i32, i32
  }
  func.func @transform_1(%arg0: i32) -> (i32, i32) {
    %c0_i32 = arith.constant 0 : i32
    %c0_i32_0 = arith.constant 0 : i32
    %c0_i32_1 = arith.constant 0 : i32
    return %c0_i32, %c0_i32_0 : i32, i32
  }
  func.func @transform_2(%arg0: i32) -> (i32, i32) {
    %c0_i32 = arith.constant 0 : i32
    %c0_i32_0 = arith.constant 0 : i32
    %c0_i32_1 = arith.constant 0 : i32
    return %c0_i32, %c0_i32_0 : i32, i32
  }
  func.func @transform_3(%arg0: i32) -> (i32, i32) {
    %c0_i32 = arith.constant 0 : i32
    %c0_i32_0 = arith.constant 0 : i32
    %c0_i32_1 = arith.constant 0 : i32
    return %c0_i32, %c0_i32_0 : i32, i32
  }
  func.func @transform_4(%arg0: i32) -> (i32, i32) {
    %c0_i32 = arith.constant 0 : i32
    %c0_i32_0 = arith.constant 0 : i32
    %c0_i32_1 = arith.constant 0 : i32
    return %c0_i32, %c0_i32_0 : i32, i32
  }
  func.func @transform_5(%arg0: i32) -> (i32, i32) {
    %c0_i32 = arith.constant 0 : i32
    %c0_i32_0 = arith.constant 0 : i32
    return %arg0, %c0_i32 : i32, i32
  }
}

</mosaic_0001>

<bundles_post_ra>
// kernel: tpu_custom_call.1
= control target key start
LH: loop header
LB: loop body
LE: loop exit
PB: predicated region body
PF: predicated region fallthrough
CT: control target
= control target key end

     0   :  { %10 = vsyncpa [#allocation3], 0  ;;  %s316_s0 = inlined_call_operand.hbm [shape: f32[8,16], index: 0, kind: input, shape index: {}]   ;;  %s317_s1 = inlined_call_operand.hbm [shape: f32[16,32], index: 1, kind: input, shape index: {}]   ;;  %s318_s2 = inlined_call_operand.vmem [shape: f32[1,32], index: 2, kind: input, shape index: {}]   ;;  %s319_s3 = inlined_call_operand.hbm [shape: f32[32,32], index: 3, kind: input, shape index: {}]   ;;  %s320_s4 = inlined_call_operand.vmem [shape: f32[1,32], index: 4, kind: input, shape index: {}]   ;;  %s321_s5 = inlined_call_operand.hbm [shape: f32[8,32], index: 5, kind: output, shape index: {}]  }
   0x1   :  { %11 = vsyncpa [#allocation6], 0  ;;  %s28_s20 = sshll.u32 %s317_s1, 4  ;;  %s29_s20 = int_to_ptr.hbm [resolvable:$true] %s28_s20 }
   0x2   :  { %12 = vsyncpa [#allocation4], 0  ;;  %s262_s21 = smov [#allocation5]   ;;  %s18_s25 = sshll.u32 %s316_s0, 4  ;;  %s19_s25 = int_to_ptr.hbm [resolvable:$true] %s18_s25 }
   0x3   :  { %s30_s22 = sshll.u32 %s262_s21, 4  ;;  %s263_s26 = smov 128   ;;  %s31_s22 = int_to_ptr.vmem [resolvable:$true] %s30_s22 }
   0x4   :  { %s264_s27 = smov 8   ;;  %s265_s28 = smov [#allocation2]  }
   0x5   :  { %36 = dma.hbm_to_vmem [thread:$0]  %s29_s20, 256, %s31_s22, [#allocation6], %s263_s26, %s263_s26, %s264_s27  }
   0x6   :  { %s20_s29 = sshll.u32 %s265_s28, 4  ;;  %s43_s7 = sshll.u32 %s319_s3, 4  ;;  %s21_s29 = int_to_ptr.vmem [resolvable:$true] %s20_s29  ;;  %s44_s7 = int_to_ptr.hbm [resolvable:$true] %s43_s7 }
   0x7   :  { %23 = dma.hbm_to_vmem [thread:$0]  %s19_s25, 128, %s21_s29, [#allocation3]  }
   0x8   :  { %s266_s1 = smov [#allocation7]  }
   0x9   :  { %s45_s8 = sshll.u32 %s266_s1, 4  ;;  %s46_s8 = int_to_ptr.vmem [resolvable:$true] %s45_s8 }
   0xa   :  { %51 = dma.hbm_to_vmem [thread:$0]  %s44_s7, 512, %s46_s8, [#allocation6], %s263_s26, %s263_s26, %s264_s27  }
   0xb   :  { %256 = dma.done.wait [#allocation3], 128  }
   0xc   :  { %257 = vsyncadd [#allocation3], 4294967168 }
   0xd   :  { %258 = dma.done.wait [#allocation6], 768  }
   0xe   :  { %259 = vsyncadd [#allocation6], 4294966528  ;;  %v68_v0 = vld [vmem:[#allocation5 + $0x8] sm:$0xff]  ;;  %v67_v1 = vld [vmem:[#allocation5] sm:$0xff]  ;;  %vm73_vm0 = vcmask 130048   ;;  %vm106_vm1 = vcmask 261120  }
   0xf   :  { %91 = vmatpush.msra.mxu0 %v68_v0  ;;  %v66_v2 = vld [vmem:[#allocation2] sm:$0xff]  ;;  %v101_v3 = vld [vmem:[#allocation7 + $0x18] sm:$0xff]  ;;  %v100_v4 = vld [vmem:[#allocation7 + $0x10] sm:$0xff]  ;;  %s267_s11 = smov [#allocation8]   ;;  %s139_s15 = sshll.u32 %s321_s5, 4  ;;  %s140_s15 = int_to_ptr.hbm [resolvable:$true] %s139_s15 }
  0x10   :  { %122 = vmatpush.msra.mxu1 %v101_v3  ;;  %v99_v5 = vld [vmem:[#allocation7 + $0x8] sm:$0xff]  ;;  %v98_v6 = vld [vmem:[#allocation7] sm:$0xff]  ;;  %s137_s12 = sshll.u32 %s267_s11, 4  ;;  %s138_s12 = int_to_ptr.vmem [resolvable:$true] %s137_s12 }
  0x11   :  { %92 = vmatpush.msra.mxu0 %v67_v1  ;;  %v158_v7 = vld [vmem:[%s318_s2] ss:$0 sm:$0xff] }
  0x12   :  { %150 = vmatmul.msk.f32.vlgmr.msra.gmra.mxu0 %vm73_vm0, %v66_v2  ;;  %123 = vmatpush.msra.mxu1 %v100_v4  ;;  %v159_v11 = vld [vmem:[%s320_s4] ss:$0 sm:$0xff] }
  0x14   :  { %124 = vmatpush.msra.mxu1 %v99_v5 }
  0x16   :  { %125 = vmatpush.msra.mxu1 %v98_v6 }
  0x8f   :  { %v94_v8 = vpop.f32.mrf.mxu0 }
  0x90   :  { %v95_v9 = vadd.f32 %v158_v7, %v94_v8 }
  0x92   :  { %v97_v10 = vmax.f32 %v95_v9, 0.0 }
  0x94   :  { %151 = vmatmul.msk.f32.vlgmr.msra.gmra.mxu1 %vm106_vm1, %v97_v10 }
 0x111   :  { %v127_v12 = vpop.f32.mrf.mxu1 }
 0x112   :  { %v128_v13 = vadd.f32 %v159_v11, %v127_v12 }
 0x114   :  { %v130_v14 = vmax.f32 %v128_v13, 0.0 }
 0x116   :  { %131 = vst.msk [vmem:[#allocation8] sm:$0xff] %vm106_vm1, %v130_v14 }
 0x117   :  { %142 = dma.vmem_to_hbm [thread:$0]  %s138_s12, 128, %s140_s15, [#allocation4]  }
 0x118   :  { %260 = dma.done.wait [#allocation4], 128  }
 0x119   :  { %261 = vsyncadd [#allocation4], 4294967168 }
 0x11a   :  { %147 = vsyncpa [#allocation3], 1 }
 0x11b   :  { %148 = vsyncpa [#allocation6], 1 }
 0x11c   :  { %149 = vsyncpa [#allocation4], 1 }

</bundles_post_ra>
